<compile_context>
chip_gen: v5e
topology: v5e:2x2
jax: 0.10.0
libtpu: 0.0.40
codegen_flags: <defaults>
</compile_context>

<pallas_src>
import functools

import jax
import jax.numpy as jnp
from jax.experimental import pallas as pl
from jax.experimental.pallas import tpu as pltpu


K_PAD = 128  # pad the (Cin*3^3 + 1 bias) = 28 im2col contraction dim to a lane-dense 128


# ----------------------------------------------------------------------------
# Fused Pallas kernel:
#   h  = relu(patches @ W_stem)                  (stem 3x3x3/s2 conv, bias folded in)
#   f  = relu(h @ W_proj + b_proj)               (1x1x1 projection conv -> res_fea)
#   z  = relu(f @ W_l1 + b_l1)                   (res_l1 + ReLU)
#   y  = z @ W_l2 + b_l2                         (res_l2)
#   out_embed tile = y reshaped (bpt, n_tok, out)
#   out_pool  tile = token mean (bpt, out), computed in-kernel in f32
# All intermediates live in VMEM / vregs; matmuls are bf16 -> f32 accumulate.
# ----------------------------------------------------------------------------
def _fused_forward_kernel(x_ref, ws_ref, wp_ref, bp_ref,
                          w1_ref, b1_ref, w2_ref, b2_ref,
                          embed_ref, pool_ref, *, n_tok):
    x = x_ref[...]                                                     # (rows, K_PAD) bf16
    h = jnp.dot(x, ws_ref[...], preferred_element_type=jnp.float32)   # stem bias folded
    h = jnp.maximum(h, 0.0)

    f = jnp.dot(h.astype(wp_ref.dtype), wp_ref[...],
                preferred_element_type=jnp.float32) + bp_ref[...]
    f = jnp.maximum(f, 0.0)                                            # res_fea rows

    z = jnp.dot(f.astype(w1_ref.dtype), w1_ref[...],
                preferred_element_type=jnp.float32) + b1_ref[...]
    z = jnp.maximum(z, 0.0)

    y = jnp.dot(z.astype(w2_ref.dtype), w2_ref[...],
                preferred_element_type=jnp.float32) + b2_ref[...]      # (rows, out) f32

    bpt = y.shape[0] // n_tok
    # (rows,128) -> (bpt, n_tok, 128): last two dims stay (8,128)-aligned -> free view split.
    y3 = y.reshape(bpt, n_tok, y.shape[-1])
    embed_ref[...] = y3.astype(embed_ref.dtype)
    pool_ref[...] = (jnp.sum(y3, axis=1) * (1.0 / n_tok)).astype(pool_ref.dtype)


def fused_forward(patches, p, *, batch, n_tok):
    """patches: (batch*n_tok, K_PAD) bf16. Returns (embed (B,n_tok,out), pool (B,out))."""
    d_stem = p["stem_w_mat"].shape[1]
    d_ftr = p["proj_w_mat"].shape[1]
    d_out = p["l2_w_mat"].shape[1]

    # Whole batches per grid tile, aiming for >=128 MXU rows per step (fills the
    # 128/256-wide MXU M dim and amortizes per-step overhead).
    bpt = max(1, min(batch, max(1, 256 // n_tok)))
    while batch % bpt != 0:
        bpt -= 1
    if (bpt * n_tok) % 8 != 0:      # row tile must respect the (8,128) tiling rule
        bpt = batch                 # fall back to a single full-extent tile
    rows = bpt * n_tok
    grid = (batch // bpt,)

    embed, pool = pl.pallas_call(
        functools.partial(_fused_forward_kernel, n_tok=n_tok),
        out_shape=(
            jax.ShapeDtypeStruct((batch, n_tok, d_out), jnp.float32),
            jax.ShapeDtypeStruct((batch, d_out), jnp.float32),
        ),
        grid=grid,
        in_specs=[
            pl.BlockSpec((rows, K_PAD), lambda i: (i, 0)),
            pl.BlockSpec((K_PAD, d_stem), lambda i: (0, 0)),
            pl.BlockSpec((d_stem, d_ftr), lambda i: (0, 0)),
            pl.BlockSpec((1, d_ftr), lambda i: (0, 0)),
            pl.BlockSpec((d_ftr, d_ftr), lambda i: (0, 0)),
            pl.BlockSpec((1, d_ftr), lambda i: (0, 0)),
            pl.BlockSpec((d_ftr, d_out), lambda i: (0, 0)),
            pl.BlockSpec((1, d_out), lambda i: (0, 0)),
        ],
        out_specs=(
            pl.BlockSpec((bpt, n_tok, d_out), lambda i: (i, 0, 0)),
            pl.BlockSpec((bpt, d_out), lambda i: (i, 0)),
        ),
        compiler_params=pltpu.CompilerParams(dimension_semantics=("parallel",)),
    )(patches,
      p["stem_w_mat"],
      p["proj_w_mat"], p["proj_b_row"],
      p["l1_w_mat"], p["l1_b_row"],
      p["l2_w_mat"], p["l2_b_row"])
    return embed, pool


# ----------------------------------------------------------------------------
# Glue: im2col for the 3x3x3 stride-2 stem conv, evaluated ONLY at the positions
# that survive the downstream ::2 spatial subsampling (effective stride 4).
# Column ordering matches PyTorch Conv3d weight layout (Cin, kD, kH, kW).
# ----------------------------------------------------------------------------
def im2col_3d_subsampled(x, k, stride, pad):
    eff = 2 * stride
    xp = jnp.pad(x, ((0, 0), (0, 0), (pad, pad), (pad, pad), (pad, pad)))
    B, C, D, H, W = xp.shape
    n1 = (D - k) // eff + 1
    n2 = (H - k) // eff + 1
    n3 = (W - k) // eff + 1
    cols = []
    for c in range(C):
        for kd in range(k):
            for kh in range(k):
                for kw in range(k):
                    cols.append(xp[:, c,
                                   kd:kd + n1 * eff:eff,
                                   kh:kh + n2 * eff:eff,
                                   kw:kw + n3 * eff:eff])
    patches = jnp.stack(cols, axis=-1)                # (B, n1, n2, n3, C*k^3)
    return patches.reshape(B * n1 * n2 * n3, C * k * k * k), (n1, n2, n3)


# ----------------------------------------------------------------------------
# Forward (matches ModelRes.forward semantics, simplified backbone).
# ----------------------------------------------------------------------------
def model_res_forward(images, prepped):
    images = images.astype(jnp.float32)               # img = images.float()
    B = images.shape[0]
    patches, (n1, n2, n3) = im2col_3d_subsampled(images, k=3, stride=2, pad=1)
    rows = patches.shape[0]
    # constant-1 column so the stem bias rides the (otherwise dead) zero-padded K rows
    patches = jnp.concatenate([patches, jnp.ones((rows, 1), patches.dtype)], axis=1)
    patches = jnp.pad(patches, ((0, 0), (0, K_PAD - patches.shape[1]))).astype(jnp.bfloat16)
    n_tok = n1 * n2 * n3
    return fused_forward(patches, prepped, batch=B, n_tok=n_tok)


# ----------------------------------------------------------------------------
# Parameters: PyTorch-layout init + one-time kernel-layout prep.
# ----------------------------------------------------------------------------
def init_params(key, cin=1, stem_c=64, num_ftrs=256, out_feature=128):
    ks = jax.random.split(key, 8)
    p = {}
    p["stem_w"] = 0.1 * jax.random.normal(ks[0], (stem_c, cin, 3, 3, 3), jnp.float32)
    p["stem_b"] = 0.01 * jax.random.normal(ks[1], (stem_c,), jnp.float32)
    p["proj_w"] = 0.05 * jax.random.normal(ks[2], (num_ftrs, stem_c), jnp.float32)     # 1x1x1 conv (out, in)
    p["proj_b"] = 0.01 * jax.random.normal(ks[3], (num_ftrs,), jnp.float32)
    p["l1_w"] = 0.02 * jax.random.normal(ks[4], (num_ftrs, num_ftrs), jnp.float32)     # res_l1 (out, in)
    p["l1_b"] = 0.01 * jax.random.normal(ks[5], (num_ftrs,), jnp.float32)
    p["l2_w"] = 0.02 * jax.random.normal(ks[6], (out_feature, num_ftrs), jnp.float32)  # res_l2 (out, in)
    p["l2_b"] = 0.01 * jax.random.normal(ks[7], (out_feature,), jnp.float32)
    return p


def prepare_params(p):
    """One-time weight prep: transpose to (in, out), append the stem bias as an extra K
    row (matched by the constant-1 patch column), pad stem K to 128, cast matmul operands
    to bf16 (remaining biases stay f32). Done once, outside the per-forward path."""
    cout = p["stem_w"].shape[0]
    stem_mat = p["stem_w"].reshape(cout, -1).T                         # (Cin*27, 64)
    stem_mat = jnp.concatenate([stem_mat, p["stem_b"].reshape(1, -1)], axis=0)
    stem_mat = jnp.pad(stem_mat, ((0, K_PAD - stem_mat.shape[0]), (0, 0)))
    return {
        "stem_w_mat": stem_mat.astype(jnp.bfloat16),
        "proj_w_mat": p["proj_w"].T.astype(jnp.bfloat16),
        "proj_b_row": p["proj_b"].reshape(1, -1).astype(jnp.float32),
        "l1_w_mat": p["l1_w"].T.astype(jnp.bfloat16),
        "l1_b_row": p["l1_b"].reshape(1, -1).astype(jnp.float32),
        "l2_w_mat": p["l2_w"].T.astype(jnp.bfloat16),
        "l2_b_row": p["l2_b"].reshape(1, -1).astype(jnp.float32),
    }


# Pure-JAX f32 reference (for correctness checking only).
def model_res_reference(images, p):
    images = images.astype(jnp.float32)
    B = images.shape[0]
    patches, (n1, n2, n3) = im2col_3d_subsampled(images, k=3, stride=2, pad=1)
    w = p["stem_w"].reshape(p["stem_w"].shape[0], -1).T
    h = jnp.maximum(patches @ w + p["stem_b"], 0.0)
    f = jnp.maximum(h @ p["proj_w"].T + p["proj_b"], 0.0)
    z = jnp.maximum(f @ p["l1_w"].T + p["l1_b"], 0.0)
    y = z @ p["l2_w"].T + p["l2_b"]
    embed = y.reshape(B, n1 * n2 * n3, -1)
    return embed, jnp.mean(embed, axis=1)


if __name__ == "__main__":
    key = jax.random.PRNGKey(0)
    pkey, xkey = jax.random.split(key)
    params = init_params(pkey)
    prepped = prepare_params(params)

    # Small synthetic 3D medical volume batch: (B, C, D, H, W) = (2, 1, 16, 16, 16)
    images = jax.random.normal(xkey, (2, 1, 16, 16, 16), jnp.float32)

    fwd = jax.jit(model_res_forward)
    out_embed, out_pool = fwd(images, prepped)
    jax.block_until_ready((out_embed, out_pool))

    assert out_embed.shape == (2, 64, 128), out_embed.shape   # (b, n1*n2*n3, out_feature)
    assert out_pool.shape == (2, 128), out_pool.shape
    # in-kernel token-mean pooling must match mean of the returned embeddings
    assert jnp.allclose(out_pool, jnp.mean(out_embed, axis=1), atol=1e-4)

    # numerical check against a pure-JAX f32 reference (bf16-matmul tolerance)
    ref_embed, ref_pool = model_res_reference(images, params)
    assert jnp.allclose(out_embed, ref_embed, atol=1e-2, rtol=5e-2), (
        float(jnp.max(jnp.abs(out_embed - ref_embed))))
    assert jnp.allclose(out_pool, ref_pool, atol=1e-2, rtol=5e-2)

    print("KERNEL_OK")
</pallas_src>

<mosaic_0001>
module attributes {stable_mosaic.version = 11 : i64} {
  func.func @_fused_forward_kernel(%arg0: i32, %arg1: memref<128x128xbf16, #tpu.memory_space<vmem>>, %arg2: memref<128x64xbf16, #tpu.memory_space<vmem>>, %arg3: memref<64x256xbf16, #tpu.memory_space<vmem>>, %arg4: memref<1x256xf32, #tpu.memory_space<vmem>>, %arg5: memref<256x256xbf16, #tpu.memory_space<vmem>>, %arg6: memref<1x256xf32, #tpu.memory_space<vmem>>, %arg7: memref<256x128xbf16, #tpu.memory_space<vmem>>, %arg8: memref<1x128xf32, #tpu.memory_space<vmem>>, %arg9: memref<2x64x128xf32, #tpu.memory_space<vmem>>, %arg10: memref<2x128xf32, #tpu.memory_space<vmem>>) attributes {dimension_semantics = [#tpu.dimension_semantics<parallel>], iteration_bounds = array<i64: 1>, scalar_prefetch = 0 : i64, scratch_operands = 0 : i64, tpu.core_type = #tpu.core_type<tc>, window_params = [{transform_indices = @transform_0, window_bounds = array<i64: 128, 128>}, {pipeline_mode = #tpu.pipeline_mode<synchronous>, transform_indices = @transform_1, window_bounds = array<i64: 128, 64>}, {pipeline_mode = #tpu.pipeline_mode<synchronous>, transform_indices = @transform_2, window_bounds = array<i64: 64, 256>}, {pipeline_mode = #tpu.pipeline_mode<synchronous>, transform_indices = @transform_3, window_bounds = array<i64: 1, 256>}, {pipeline_mode = #tpu.pipeline_mode<synchronous>, transform_indices = @transform_4, window_bounds = array<i64: 256, 256>}, {pipeline_mode = #tpu.pipeline_mode<synchronous>, transform_indices = @transform_5, window_bounds = array<i64: 1, 256>}, {pipeline_mode = #tpu.pipeline_mode<synchronous>, transform_indices = @transform_6, window_bounds = array<i64: 256, 128>}, {pipeline_mode = #tpu.pipeline_mode<synchronous>, transform_indices = @transform_7, window_bounds = array<i64: 1, 128>}, {transform_indices = @transform_8, window_bounds = array<i64: 2, 64, 128>}, {transform_indices = @transform_9, window_bounds = array<i64: 2, 128>}]} {
    %c0 = arith.constant 0 : index
    %c0_0 = arith.constant 0 : index
    %0 = vector.load %arg1[%c0, %c0_0] : memref<128x128xbf16, #tpu.memory_space<vmem>>, vector<128x128xbf16>
    %c0_1 = arith.constant 0 : index
    %c0_2 = arith.constant 0 : index
    %1 = vector.load %arg2[%c0_1, %c0_2] : memref<128x64xbf16, #tpu.memory_space<vmem>>, vector<128x64xbf16>
    %cst = arith.constant dense<0.000000e+00> : vector<128x64xf32>
    %2 = tpu.matmul %0, %1, %cst {dimension_numbers = #tpu.dot_dimension_numbers<[1], [0], [0], [1], [0, 0, 1, 1], [], []>} : vector<128x128xbf16>, vector<128x64xbf16>, vector<128x64xf32> -> vector<128x64xf32>
    %cst_3 = arith.constant 0.000000e+00 : f32
    %3 = vector.broadcast %cst_3 : f32 to vector<128x64xf32>
    %4 = arith.maximumf %2, %3 : vector<128x64xf32>
    %5 = arith.truncf %4 : vector<128x64xf32> to vector<128x64xbf16>
    %c0_4 = arith.constant 0 : index
    %c0_5 = arith.constant 0 : index
    %6 = vector.load %arg3[%c0_4, %c0_5] : memref<64x256xbf16, #tpu.memory_space<vmem>>, vector<64x256xbf16>
    %cst_6 = arith.constant dense<0.000000e+00> : vector<128x256xf32>
    %7 = tpu.matmul %5, %6, %cst_6 {dimension_numbers = #tpu.dot_dimension_numbers<[1], [0], [0], [1], [0, 0, 1, 1], [], []>} : vector<128x64xbf16>, vector<64x256xbf16>, vector<128x256xf32> -> vector<128x256xf32>
    %c0_7 = arith.constant 0 : index
    %c0_8 = arith.constant 0 : index
    %8 = vector.load %arg4[%c0_7, %c0_8] : memref<1x256xf32, #tpu.memory_space<vmem>>, vector<1x256xf32>
    %9 = vector.broadcast %8 : vector<1x256xf32> to vector<128x256xf32>
    %10 = arith.addf %7, %9 : vector<128x256xf32>
    %cst_9 = arith.constant 0.000000e+00 : f32
    %11 = vector.broadcast %cst_9 : f32 to vector<128x256xf32>
    %12 = arith.maximumf %10, %11 : vector<128x256xf32>
    %13 = arith.truncf %12 : vector<128x256xf32> to vector<128x256xbf16>
    %c0_10 = arith.constant 0 : index
    %c0_11 = arith.constant 0 : index
    %14 = vector.load %arg5[%c0_10, %c0_11] : memref<256x256xbf16, #tpu.memory_space<vmem>>, vector<256x256xbf16>
    %cst_12 = arith.constant dense<0.000000e+00> : vector<128x256xf32>
    %15 = tpu.matmul %13, %14, %cst_12 {dimension_numbers = #tpu.dot_dimension_numbers<[1], [0], [0], [1], [0, 0, 1, 1], [], []>} : vector<128x256xbf16>, vector<256x256xbf16>, vector<128x256xf32> -> vector<128x256xf32>
    %c0_13 = arith.constant 0 : index
    %c0_14 = arith.constant 0 : index
    %16 = vector.load %arg6[%c0_13, %c0_14] : memref<1x256xf32, #tpu.memory_space<vmem>>, vector<1x256xf32>
    %17 = vector.broadcast %16 : vector<1x256xf32> to vector<128x256xf32>
    %18 = arith.addf %15, %17 : vector<128x256xf32>
    %cst_15 = arith.constant 0.000000e+00 : f32
    %19 = vector.broadcast %cst_15 : f32 to vector<128x256xf32>
    %20 = arith.maximumf %18, %19 : vector<128x256xf32>
    %21 = arith.truncf %20 : vector<128x256xf32> to vector<128x256xbf16>
    %c0_16 = arith.constant 0 : index
    %c0_17 = arith.constant 0 : index
    %22 = vector.load %arg7[%c0_16, %c0_17] : memref<256x128xbf16, #tpu.memory_space<vmem>>, vector<256x128xbf16>
    %cst_18 = arith.constant dense<0.000000e+00> : vector<128x128xf32>
    %23 = tpu.matmul %21, %22, %cst_18 {dimension_numbers = #tpu.dot_dimension_numbers<[1], [0], [0], [1], [0, 0, 1, 1], [], []>} : vector<128x256xbf16>, vector<256x128xbf16>, vector<128x128xf32> -> vector<128x128xf32>
    %c0_19 = arith.constant 0 : index
    %c0_20 = arith.constant 0 : index
    %24 = vector.load %arg8[%c0_19, %c0_20] : memref<1x128xf32, #tpu.memory_space<vmem>>, vector<1x128xf32>
    %25 = vector.broadcast %24 : vector<1x128xf32> to vector<128x128xf32>
    %26 = arith.addf %23, %25 : vector<128x128xf32>
    %27 = vector.shape_cast %26 : vector<128x128xf32> to vector<2x64x128xf32>
    %c0_21 = arith.constant 0 : index
    %c0_22 = arith.constant 0 : index
    %c0_23 = arith.constant 0 : index
    %28 = vector.load %arg9[%c0_21, %c0_22, %c0_23] : memref<2x64x128xf32, #tpu.memory_space<vmem>>, vector<2x64x128xf32>
    tpu.vector_store %arg9[%c0_21, %c0_22, %c0_23], %27 {strides = array<i32>} : memref<2x64x128xf32, #tpu.memory_space<vmem>>, vector<2x64x128xf32>,
    %cst_24 = arith.constant dense<0.000000e+00> : vector<2x128xf32>
    %29 = vector.multi_reduction <add>, %27, %cst_24 [1] : vector<2x64x128xf32> to vector<2x128xf32>
    %cst_25 = arith.constant 1.562500e-02 : f32
    %30 = vector.broadcast %cst_25 : f32 to vector<2x128xf32>
    %31 = arith.mulf %29, %30 : vector<2x128xf32>
    %c0_26 = arith.constant 0 : index
    %c0_27 = arith.constant 0 : index
    %32 = vector.load %arg10[%c0_26, %c0_27] : memref<2x128xf32, #tpu.memory_space<vmem>>, vector<2x128xf32>
    tpu.vector_store %arg10[%c0_26, %c0_27], %31 {strides = array<i32>} : memref<2x128xf32, #tpu.memory_space<vmem>>, vector<2x128xf32>,
    return
  }
  func.func @transform_0(%arg0: i32) -> (i32, i32) {
    %c0_i32 = arith.constant 0 : i32
    %c0_i32_0 = arith.constant 0 : i32
    return %arg0, %c0_i32 : i32, i32
  }
  func.func @transform_1(%arg0: i32) -> (i32, i32) {
    %c0_i32 = arith.constant 0 : i32
    %c0_i32_0 = arith.constant 0 : i32
    %c0_i32_1 = arith.constant 0 : i32
    return %c0_i32, %c0_i32_0 : i32, i32
  }
  func.func @transform_2(%arg0: i32) -> (i32, i32) {
    %c0_i32 = arith.constant 0 : i32
    %c0_i32_0 = arith.constant 0 : i32
    %c0_i32_1 = arith.constant 0 : i32
    return %c0_i32, %c0_i32_0 : i32, i32
  }
  func.func @transform_3(%arg0: i32) -> (i32, i32) {
    %c0_i32 = arith.constant 0 : i32
    %c0_i32_0 = arith.constant 0 : i32
    %c0_i32_1 = arith.constant 0 : i32
    return %c0_i32, %c0_i32_0 : i32, i32
  }
  func.func @transform_4(%arg0: i32) -> (i32, i32) {
    %c0_i32 = arith.constant 0 : i32
    %c0_i32_0 = arith.constant 0 : i32
    %c0_i32_1 = arith.constant 0 : i32
    return %c0_i32, %c0_i32_0 : i32, i32
  }
  func.func @transform_5(%arg0: i32) -> (i32, i32) {
    %c0_i32 = arith.constant 0 : i32
    %c0_i32_0 = arith.constant 0 : i32
    %c0_i32_1 = arith.constant 0 : i32
    return %c0_i32, %c0_i32_0 : i32, i32
  }
  func.func @transform_6(%arg0: i32) -> (i32, i32) {
    %c0_i32 = arith.constant 0 : i32
    %c0_i32_0 = arith.constant 0 : i32
    %c0_i32_1 = arith.constant 0 : i32
    return %c0_i32, %c0_i32_0 : i32, i32
  }
  func.func @transform_7(%arg0: i32) -> (i32, i32) {
    %c0_i32 = arith.constant 0 : i32
    %c0_i32_0 = arith.constant 0 : i32
    %c0_i32_1 = arith.constant 0 : i32
    return %c0_i32, %c0_i32_0 : i32, i32
  }
  func.func @transform_8(%arg0: i32) -> (i32, i32, i32) {
    %c0_i32 = arith.constant 0 : i32
    %c0_i32_0 = arith.constant 0 : i32
    %c0_i32_1 = arith.constant 0 : i32
    return %arg0, %c0_i32, %c0_i32_0 : i32, i32, i32
  }
  func.func @transform_9(%arg0: i32) -> (i32, i32) {
    %c0_i32 = arith.constant 0 : i32
    %c0_i32_0 = arith.constant 0 : i32
    return %arg0, %c0_i32 : i32, i32
  }
}

</mosaic_0001>

<bundles_post_ra>
// kernel: model_res_forward.1
= control target key start
LH: loop header
LB: loop body
LE: loop exit
PB: predicated region body
PF: predicated region fallthrough
CT: control target
= control target key end

     0   :  { %15 = vsyncpa [#allocation3], 0  ;;  %s2228_s0 = inlined_call_operand.vmem [shape: bf16[128,128], index: 0, kind: input, shape index: {}]   ;;  %s2229_s1 = inlined_call_operand.vmem [shape: bf16[128,64], index: 1, kind: input, shape index: {}]   ;;  %s2230_s2 = inlined_call_operand.vmem [shape: bf16[64,256], index: 2, kind: input, shape index: {}]   ;;  %s2231_s3 = inlined_call_operand.vmem [shape: f32[1,256], index: 3, kind: input, shape index: {}]   ;;  %s2232_s4 = inlined_call_operand.vmem [shape: bf16[256,256], index: 4, kind: input, shape index: {}]   ;;  %s2233_s5 = inlined_call_operand.vmem [shape: f32[1,256], index: 5, kind: input, shape index: {}]   ;;  %s2234_s6 = inlined_call_operand.vmem [shape: bf16[256,128], index: 6, kind: input, shape index: {}]   ;;  %s2235_s7 = inlined_call_operand.vmem [shape: f32[1,128], index: 7, kind: input, shape index: {}]   ;;  %s2236_s8 = inlined_call_operand.hbm [shape: f32[2,64,128], index: 8, kind: output, shape index: {0}]   ;;  %s2237_s9 = inlined_call_operand.hbm [shape: f32[2,128], index: 9, kind: output, shape index: {1}]  }
   0x1   :  { %v1535_v0 = vld [vmem:[%s2229_s1 + $0x38] sm:$0xff]  ;;  %v1534_v1 = vld [vmem:[%s2229_s1 + $0x30] sm:$0xff] }
   0x2   :  { %162 = vmatpush.bf16.msra.mxu0 %v1535_v0 }
   0x3   :  { %16 = vsyncpa [#allocation5], 0  ;;  %v1533_v2 = vld [vmem:[%s2229_s1 + $0x28] sm:$0xff]  ;;  %v1532_v3 = vld [vmem:[%s2229_s1 + $0x20] sm:$0xff]  ;;  %vm289_vm0 = vcmask 523264   ;;  %s1188_s20 = sshll.u32 %s2236_s8, 4  ;;  %s1189_s20 = int_to_ptr.hbm [resolvable:$true] %s1188_s20 }
   0x4   :  { %v1531_v4 = vld [vmem:[%s2229_s1 + $0x18] sm:$0xff]  ;;  %v1530_v5 = vld [vmem:[%s2229_s1 + $0x10] sm:$0xff]  ;;  %v1529_v6 = vld [vmem:[%s2229_s1 + $0x8] sm:$0xff]  ;;  %s1658_s21 = smov 128   ;;  %s1659_s22 = smov 8   ;;  %vm1178_vm1 = vcmask 1041409  }
   0x5   :  { %v1528_v7 = vld [vmem:[%s2229_s1] sm:$0xff]  ;;  %v1521_v9 = vld [vmem:[%s2228_s0 + $0x8] sm:$0xff]  ;;  %v1522_v10 = vld [vmem:[%s2228_s0 + $0x10] sm:$0xff]  ;;  %s1660_s8 = smov [#allocation4]   ;;  %s1202_s26 = sshll.u32 %s2237_s9, 4  ;;  %s1203_s26 = int_to_ptr.hbm [resolvable:$true] %s1202_s26 }
   0x6   :  { %163 = vmatpush.bf16.msra.mxu0 %v1534_v1  ;;  %v1520_v8 = vld [vmem:[%s2228_s0] sm:$0xff]  ;;  %v1523_v11 = vld [vmem:[%s2228_s0 + $0x18] sm:$0xff]  ;;  %v1306_v13 = vld [vmem:[%s2230_s2 + $0x30] sm:$0xf]  ;;  %s1200_s23 = sshll.u32 %s1660_s8, 4  ;;  %s1201_s23 = int_to_ptr.vmem [resolvable:$true] %s1200_s23 }
   0x7   :  { %v1524_v12 = vld [vmem:[%s2228_s0 + $0x20] sm:$0xff]  ;;  %v1543_v14 = vld [vmem:[%s2230_s2 + $0x34] sm:$0xf0]  ;;  %v1525_v16 = vld [vmem:[%s2228_s0 + $0x28] sm:$0xff] }
   0x8   :  { %v1307_v15 = vor.u32 %v1543_v14, %v1306_v13  ;;  %v1526_v17 = vld [vmem:[%s2228_s0 + $0x30] sm:$0xff]  ;;  %v1298_v18 = vld [vmem:[%s2230_s2 + $0x20] sm:$0xf]  ;;  %v1541_v19 = vld [vmem:[%s2230_s2 + $0x24] sm:$0xf0] }
   0x9   :  { %v1299_v20 = vor.u32 %v1541_v19, %v1298_v18  ;;  %v1290_v21 = vld [vmem:[%s2230_s2 + $0x10] sm:$0xf]  ;;  %v1539_v22 = vld [vmem:[%s2230_s2 + $0x14] sm:$0xf0]  ;;  %v1282_v24 = vld [vmem:[%s2230_s2] sm:$0xf] }
   0xa   :  { %164 = vmatpush.bf16.msra.mxu0 %v1533_v2  ;;  %318 = vmatpush.bf16.msra.mxu1 %v1307_v15  ;;  %v1291_v23 = vor.u32 %v1539_v22, %v1290_v21  ;;  %v1537_v25 = vld [vmem:[%s2230_s2 + $0x4] sm:$0xf0]  ;;  %v1527_v27 = vld [vmem:[%s2228_s0 + $0x38] sm:$0xff]  ;;  %v1542_v38 = vld [vmem:[%s2230_s2 + $0x34] sm:$0xf] }
   0xb   :  { %1592 = vmatpush.bf16.msra.mxu2 %v1307_v15  ;;  %1593 = vmatpush.bf16.msra.mxu3 %v1307_v15  ;;  %v1283_v26 = vor.u32 %v1537_v25, %v1282_v24  ;;  %v1308_v39 = vld [vmem:[%s2230_s2 + $0x38] sm:$0xf0]  ;;  %v1540_v46 = vld [vmem:[%s2230_s2 + $0x24] sm:$0xf]  ;;  %v1300_v47 = vld [vmem:[%s2230_s2 + $0x28] sm:$0xf0] }
   0xc   :  { %v1311_v40 = vor.u32 %v1542_v38, %v1308_v39  ;;  %v1303_v48 = vor.u32 %v1540_v46, %v1300_v47  ;;  %v1538_v50 = vld [vmem:[%s2230_s2 + $0x14] sm:$0xf]  ;;  %v1292_v51 = vld [vmem:[%s2230_s2 + $0x18] sm:$0xf0]  ;;  %v1536_v57 = vld [vmem:[%s2230_s2 + $0x4] sm:$0xf] }
   0xd   :  { %v1295_v52 = vor.u32 %v1538_v50, %v1292_v51  ;;  %v1284_v58 = vld [vmem:[%s2230_s2 + $0x8] sm:$0xf0]  ;;  %v1386_v1 = vld [vmem:[%s2232_s4 + $0x70] sm:$0xf]  ;;  %v1559_v2 = vld [vmem:[%s2232_s4 + $0x74] sm:$0xf0] }
   0xe   :  { %165 = vmatpush.bf16.msra.mxu0 %v1532_v3  ;;  %319 = vmatpush.bf16.msra.mxu1 %v1299_v20  ;;  %v1287_v59 = vor.u32 %v1536_v57, %v1284_v58  ;;  %v1387_v3 = vor.u32 %v1559_v2, %v1386_v1  ;;  %v1388_v13 = vld [vmem:[%s2232_s4 + $0x78] sm:$0xf0]  ;;  %v1370_v14 = vld [vmem:[%s2232_s4 + $0x50] sm:$0xf]  ;;  %v1553_v19 = vld [vmem:[%s2232_s4 + $0x44] sm:$0xf0] }
   0xf   :  { %1594 = vmatpush.bf16.msra.mxu2 %v1299_v20  ;;  %1595 = vmatpush.bf16.msra.mxu3 %v1299_v20  ;;  %v1574_v20 = vld [vmem:[%s2232_s4 + $0xf4] sm:$0xf]  ;;  %v1452_v21 = vld [vmem:[%s2232_s4 + $0xf8] sm:$0xf0]  ;;  %v1380_v38 = vld [vmem:[%s2232_s4 + $0x68] sm:$0xf0] }
  0x10   :  { %v1572_v47 = vld [vmem:[%s2232_s4 + $0xe4] sm:$0xf]  ;;  %v1570_v58 = vld [vmem:[%s2232_s4 + $0xd4] sm:$0xf]  ;;  %v1364_v1 = vld [vmem:[%s2232_s4 + $0x48] sm:$0xf0] }
  0x12   :  { %166 = vmatpush.bf16.msra.mxu0 %v1531_v4  ;;  %320 = vmatpush.bf16.msra.mxu1 %v1291_v23 }
  0x13   :  { %1596 = vmatpush.bf16.msra.mxu2 %v1291_v23  ;;  %1597 = vmatpush.bf16.msra.mxu3 %v1291_v23  ;;  %v1455_v23 = vor.u32 %v1574_v20, %v1452_v21 }
  0x16   :  { %167 = vmatpush.bf16.msra.mxu0 %v1530_v5  ;;  %321 = vmatpush.bf16.msra.mxu1 %v1283_v26 }
  0x17   :  { %1598 = vmatpush.bf16.msra.mxu2 %v1283_v26  ;;  %1599 = vmatpush.bf16.msra.mxu3 %v1283_v26  ;;  %v1354_v26 = vld [vmem:[%s2232_s4 + $0x30] sm:$0xf] }
  0x1a   :  { %168 = vmatpush.bf16.msra.mxu0 %v1529_v6 }
  0x1b   :  { %367 = vmatpush.bf16.msrb.mxu2 %v1311_v40  ;;  %658 = vmatpush.bf16.msrb.mxu3 %v1387_v3  ;;  %v1338_v40 = vld [vmem:[%s2232_s4 + $0x10] sm:$0xf] }
  0x1e   :  { %169 = vmatpush.bf16.msra.mxu0 %v1528_v7 }
  0x1f   :  { %368 = vmatpush.bf16.msrb.mxu2 %v1303_v48  ;;  %v1444_v48 = vld [vmem:[%s2232_s4 + $0xe8] sm:$0xf0] }
  0x21   :  { %170 = vmatmul.bf16.vlgmr.msra.gmra.mxu0 %v1520_v8 }
  0x22   :  { %805 = vmatpush.bf16.msrb.mxu0 %v1455_v23 }
  0x23   :  { %369 = vmatpush.bf16.msrb.mxu2 %v1295_v52 }
  0x27   :  { %370 = vmatpush.bf16.msrb.mxu2 %v1287_v59 }
  0x31   :  { %175 = vmatmul.bf16.gmra.mxu0 %v1521_v9  ;;  %v1378_v9 = vld [vmem:[%s2232_s4 + $0x60] sm:$0xf] }
  0x41   :  { %180 = vmatmul.bf16.gmra.mxu0 %v1522_v10  ;;  %v1557_v10 = vld [vmem:[%s2232_s4 + $0x64] sm:$0xf0] }
  0x51   :  { %185 = vmatmul.bf16.gmra.mxu0 %v1523_v11  ;;  %v1379_v11 = vor.u32 %v1557_v10, %v1378_v9  ;;  %v1428_v9 = vld [vmem:[%s2232_s4 + $0xc8] sm:$0xf0] }
  0x53   :  { %659 = vmatpush.bf16.msrb.mxu3 %v1379_v11 }
  0x61   :  { %190 = vmatmul.bf16.gmra.mxu0 %v1524_v12  ;;  %v1558_v12 = vld [vmem:[%s2232_s4 + $0x74] sm:$0xf] }
  0x62   :  { %v1391_v15 = vor.u32 %v1558_v12, %v1388_v13  ;;  %v1550_v13 = vld [vmem:[%s2232_s4 + $0x34] sm:$0xf] }
  0x71   :  { %195 = vmatmul.bf16.gmra.mxu0 %v1525_v16  ;;  %v1555_v16 = vld [vmem:[%s2232_s4 + $0x54] sm:$0xf0] }
  0x72   :  { %v1371_v18 = vor.u32 %v1555_v16, %v1370_v14  ;;  %v1356_v14 = vld [vmem:[%s2232_s4 + $0x38] sm:$0xf0] }
  0x74   :  { %660 = vmatpush.bf16.msrb.mxu3 %v1371_v18 }
  0x81   :  { %200 = vmatmul.bf16.gmra.mxu0 %v1526_v17  ;;  %v1362_v17 = vld [vmem:[%s2232_s4 + $0x40] sm:$0xf] }
  0x82   :  { %v1363_v24 = vor.u32 %v1553_v19, %v1362_v17  ;;  %v1566_v19 = vld [vmem:[%s2232_s4 + $0xb4] sm:$0xf] }
  0x84   :  { %661 = vmatpush.bf16.msrb.mxu3 %v1363_v24 }
  0x91   :  { %205 = vmatmul.bf16.gmra.mxu0 %v1527_v27  ;;  %v1551_v27 = vld [vmem:[%s2232_s4 + $0x34] sm:$0xf0] }
  0x9e   :  { %v171_v28 = vpop.f32.mrf.mxu0 }
  0x9f   :  { %v211_v30 = vmax.f32 %v171_v28, 0.0 }
  0xa6   :  { %v173_v29 = vpop.f32.mrf.mxu0 }
  0xa7   :  { %v212_v31 = vmax.f32 %v173_v29, 0.0  ;;  %v1355_v29 = vor.u32 %v1551_v27, %v1354_v26  ;;  %v1575_v26 = vld [vmem:[%s2232_s4 + $0xf4] sm:$0xf0]  ;;  %v1548_v27 = vld [vmem:[%s2232_s4 + $0x24] sm:$0xf] }
  0xa9   :  { %v1783_v32 = vpack.c.bf16 %v212_v31, %v211_v30  ;;  %662 = vmatpush.bf16.msrb.mxu3 %v1355_v29  ;;  %v1348_v29 = vld [vmem:[%s2232_s4 + $0x28] sm:$0xf0] }
  0xab   :  { %1312 = vmatmul.msk.bf16.vlgmr.msra.gmra.mxu1 %vm289_vm0, %v1783_v32 }
  0xae   :  { %v176_v33 = vpop.f32.mrf.mxu0 }
  0xaf   :  { %v213_v35 = vmax.f32 %v176_v33, 0.0  ;;  %v1346_v33 = vld [vmem:[%s2232_s4 + $0x20] sm:$0xf] }
  0xb6   :  { %v178_v34 = vpop.f32.mrf.mxu0 }
  0xb7   :  { %v214_v36 = vmax.f32 %v178_v34, 0.0  ;;  %v1549_v34 = vld [vmem:[%s2232_s4 + $0x24] sm:$0xf0] }
  0xb9   :  { %v1787_v37 = vpack.c.bf16 %v214_v36, %v213_v35  ;;  %v1347_v35 = vor.u32 %v1549_v34, %v1346_v33  ;;  %v1556_v36 = vld [vmem:[%s2232_s4 + $0x64] sm:$0xf] }
  0xba   :  { %v1383_v39 = vor.u32 %v1556_v36, %v1380_v38  ;;  %v1573_v36 = vld [vmem:[%s2232_s4 + $0xe4] sm:$0xf0]  ;;  %v1564_v38 = vld [vmem:[%s2232_s4 + $0xa4] sm:$0xf] }
  0xbb   :  { %1313 = vmatmul.msk.bf16.gmra.mxu1 %vm289_vm0, %v1787_v37  ;;  %663 = vmatpush.bf16.msrb.mxu3 %v1347_v35  ;;  %v1442_v35 = vld [vmem:[%s2232_s4 + $0xe0] sm:$0xf] }
  0xbe   :  { %v181_v41 = vpop.f32.mrf.mxu0 }
  0xbf   :  { %v215_v43 = vmax.f32 %v181_v41, 0.0 }
  0xc6   :  { %v183_v42 = vpop.f32.mrf.mxu0 }
  0xc7   :  { %v216_v44 = vmax.f32 %v183_v42, 0.0 }
  0xc9   :  { %v1797_v45 = vpack.c.bf16 %v216_v44, %v215_v43  ;;  %v1330_v43 = vld [vmem:[%s2232_s4] sm:$0xf]  ;;  %v1545_v44 = vld [vmem:[%s2232_s4 + $0x4] sm:$0xf0] }
  0xca   :  { %v1331_v46 = vor.u32 %v1545_v44, %v1330_v43  ;;  %v1434_v44 = vld [vmem:[%s2232_s4 + $0xd0] sm:$0xf] }
  0xcb   :  { %1314 = vmatmul.msk.bf16.gmra.mxu1 %vm289_vm0, %v1797_v45 }
  0xce   :  { %v186_v49 = vpop.f32.mrf.mxu0 }
  0xcf   :  { %v217_v54 = vmax.f32 %v186_v49, 0.0  ;;  %v1447_v49 = vor.u32 %v1572_v47, %v1444_v48  ;;  %v1546_v48 = vld [vmem:[%s2232_s4 + $0x14] sm:$0xf] }
  0xd1   :  { %806 = vmatpush.bf16.msrb.mxu0 %v1447_v49  ;;  %v1340_v49 = vld [vmem:[%s2232_s4 + $0x18] sm:$0xf0] }
  0xd6   :  { %v188_v53 = vpop.f32.mrf.mxu0 }
  0xd7   :  { %v218_v55 = vmax.f32 %v188_v53, 0.0 }
  0xd9   :  { %v1813_v56 = vpack.c.bf16 %v218_v55, %v217_v54  ;;  %v1554_v54 = vld [vmem:[%s2232_s4 + $0x54] sm:$0xf]  ;;  %v1372_v55 = vld [vmem:[%s2232_s4 + $0x58] sm:$0xf0] }
  0xda   :  { %v1375_v57 = vor.u32 %v1554_v54, %v1372_v55  ;;  %v1418_v55 = vld [vmem:[%s2232_s4 + $0xb0] sm:$0xf] }
  0xdb   :  { %1315 = vmatmul.msk.bf16.vlgmr.msra.gmra.mxu2 %vm289_vm0, %v1813_v56 }
  0xdc   :  { %756 = vmatpush.bf16.msra.mxu2 %v1391_v15  ;;  %v1359_v15 = vor.u32 %v1550_v13, %v1356_v14  ;;  %v1402_v14 = vld [vmem:[%s2232_s4 + $0x90] sm:$0xf] }
  0xde   :  { %v191_v60 = vpop.f32.mrf.mxu0 }
  0xdf   :  { %v219_v62 = vmax.f32 %v191_v60, 0.0  ;;  %v1930_v60 = vld [vmem:[%s2231_s3] sm:$0x3] }
  0xe0   :  { %757 = vmatpush.bf16.msra.mxu2 %v1383_v39  ;;  %v1443_v39 = vor.u32 %v1573_v36, %v1442_v35  ;;  %v1583_v35 = vld [vmem:[%s2234_s6 + $0x38] sm:$0xff] }
  0xe4   :  { %758 = vmatpush.bf16.msra.mxu2 %v1375_v57  ;;  %v1567_v57 = vld [vmem:[%s2232_s4 + $0xb4] sm:$0xf0] }
  0xe6   :  { %v193_v61 = vpop.f32.mrf.mxu0 }
  0xe7   :  { %v220_v63 = vmax.f32 %v193_v61, 0.0 }
  0xe9   :  { %v1823_v0 = vpack.c.bf16 %v220_v63, %v219_v62  ;;  %v1933_v62 = vperm.slane %v1930_v60, 0  ;;  %v1552_v63 = vld [vmem:[%s2232_s4 + $0x44] sm:$0xf] }
  0xea   :  { %v1367_v2 = vor.u32 %v1552_v63, %v1364_v1  ;;  %v1544_v1 = vld [vmem:[%s2232_s4 + $0x4] sm:$0xf] }
  0xeb   :  { %1316 = vmatmul.msk.bf16.gmra.mxu2 %vm289_vm0, %v1823_v0 }
  0xec   :  { %759 = vmatpush.bf16.msra.mxu2 %v1367_v2  ;;  %v1332_v2 = vld [vmem:[%s2232_s4 + $0x8] sm:$0xf0] }
  0xee   :  { %v196_v4 = vpop.f32.mrf.mxu0 }
  0xef   :  { %v221_v6 = vmax.f32 %v196_v4, 0.0 }
  0xf0   :  { %760 = vmatpush.bf16.msra.mxu2 %v1359_v15  ;;  %v1563_v15 = vld [vmem:[%s2232_s4 + $0x94] sm:$0xf0] }
  0xf6   :  { %v198_v5 = vpop.f32.mrf.mxu0 }
  0xf7   :  { %v222_v7 = vmax.f32 %v198_v5, 0.0 }
  0xf9   :  { %v1833_v8 = vpack.c.bf16 %v222_v7, %v221_v6 }
  0xfb   :  { %1317 = vmatmul.msk.bf16.gmra.mxu2 %vm289_vm0, %v1833_v8 }
  0xfe   :  { %v201_v22 = vpop.f32.mrf.mxu0 }
  0xff   :  { %v223_v25 = vmax.f32 %v201_v22, 0.0 }
 0x106   :  { %v203_v28 = vpop.f32.mrf.mxu0 }
 0x107   :  { %v224_v30 = vmax.f32 %v203_v28, 0.0 }
 0x109   :  { %v1873_v31 = vpack.c.bf16 %v224_v30, %v223_v25  ;;  %v1450_v25 = vld [vmem:[%s2232_s4 + $0xf0] sm:$0xf] }
 0x10a   :  { %v1451_v28 = vor.u32 %v1575_v26, %v1450_v25 }
 0x10b   :  { %1320 = vmatmul.msk.bf16.vlgmr.msrb.gmra.mxu2 %vm289_vm0, %v1783_v32  ;;  %1318 = vmatmul.msk.bf16.vlgmr.msra.gmra.mxu3 %vm289_vm0, %v1873_v31  ;;  %v1547_v32 = vld [vmem:[%s2232_s4 + $0x14] sm:$0xf0] }
 0x10c   :  { %v1339_v42 = vor.u32 %v1547_v32, %v1338_v40  ;;  %707 = vmatpush.bf16.msrb.mxu1 %v1451_v28  ;;  %v1412_v40 = vld [vmem:[%s2232_s4 + $0xa8] sm:$0xf0] }
 0x10e   :  { %v206_v41 = vpop.f32.mrf.mxu0  ;;  %664 = vmatpush.bf16.msrb.mxu3 %v1339_v42  ;;  %v1415_v42 = vor.u32 %v1564_v38, %v1412_v40  ;;  %v2090_v38 = vperm.slane %v1930_v60, 1 }
 0x10f   :  { %v225_v50 = vmax.f32 %v206_v41, 0.0 }
 0x110   :  { %708 = vmatpush.bf16.msrb.mxu1 %v1443_v39  ;;  %v1591_v39 = vld [vmem:[%s2234_s6 + $0x78] sm:$0xff] }
 0x112   :  { %665 = vmatpush.bf16.msrb.mxu3 %v1331_v46  ;;  %v1571_v46 = vld [vmem:[%s2232_s4 + $0xd4] sm:$0xf0] }
 0x113   :  { %v1435_v47 = vor.u32 %v1571_v46, %v1434_v44  ;;  %v1582_v44 = vld [vmem:[%s2234_s6 + $0x30] sm:$0xff] }
 0x115   :  { %709 = vmatpush.bf16.msrb.mxu1 %v1435_v47  ;;  %v1590_v47 = vld [vmem:[%s2234_s6 + $0x70] sm:$0xff] }
 0x116   :  { %v208_v51 = vpop.f32.mrf.mxu0  ;;  %1034 = vmatpush.bf16.msra.mxu3 %v1583_v35 }
 0x117   :  { %v226_v52 = vmax.f32 %v208_v51, 0.0  ;;  %v1343_v51 = vor.u32 %v1546_v48, %v1340_v49 }
 0x119   :  { %v1909_v53 = vpack.c.bf16 %v226_v52, %v225_v50  ;;  %v1426_v52 = vld [vmem:[%s2232_s4 + $0xc0] sm:$0xf] }
 0x11a   :  { %1035 = vmatpush.bf16.msra.mxu3 %v1582_v44 }
 0x11b   :  { %1321 = vmatmul.msk.bf16.gmra.mxu2 %vm289_vm0, %v1787_v37  ;;  %1319 = vmatmul.msk.bf16.gmra.mxu3 %vm289_vm0, %v1909_v53  ;;  %v1436_v37 = vld [vmem:[%s2232_s4 + $0xd8] sm:$0xf0] }
 0x11c   :  { %v1439_v59 = vor.u32 %v1570_v58, %v1436_v37  ;;  %v1562_v58 = vld [vmem:[%s2232_s4 + $0x94] sm:$0xf]  ;;  %v1404_v37 = vld [vmem:[%s2232_s4 + $0x98] sm:$0xf0] }
 0x11e   :  { %807 = vmatpush.bf16.msrb.mxu0 %v1439_v59  ;;  %v1419_v59 = vor.u32 %v1567_v57, %v1418_v55 }
 0x128   :  { %v323_v61 = vpop.f32.mrf.mxu1 }
 0x129   :  { %v324_v3 = vadd.f32 %v323_v61, %v1933_v62  ;;  %v1407_v61 = vor.u32 %v1562_v58, %v1404_v37  ;;  %v1589_v58 = vld [vmem:[%s2234_s6 + $0x68] sm:$0xff] }
 0x12b   :  { %1322 = vmatmul.msk.bf16.gmra.mxu2 %vm289_vm0, %v1797_v45  ;;  %v412_v6 = vmax.f32 %v324_v3, 0.0  ;;  %v1568_v45 = vld [vmem:[%s2232_s4 + $0xc4] sm:$0xf] }
 0x12c   :  { %v1431_v10 = vor.u32 %v1568_v45, %v1428_v9  ;;  %v1410_v45 = vld [vmem:[%s2232_s4 + $0xa0] sm:$0xf]  ;;  %v1565_v9 = vld [vmem:[%s2232_s4 + $0xa4] sm:$0xf0] }
 0x12e   :  { %808 = vmatpush.bf16.msrb.mxu0 %v1431_v10  ;;  %v1411_v10 = vor.u32 %v1565_v9, %v1410_v45 }
 0x130   :  { %v325_v4 = vpop.f32.mrf.mxu1 }
 0x131   :  { %v326_v5 = vadd.f32 %v325_v4, %v1933_v62  ;;  %v1335_v4 = vor.u32 %v1544_v1, %v1332_v2 }
 0x133   :  { %v414_v7 = vmax.f32 %v326_v5, 0.0 }
 0x135   :  { %v1951_v11 = vpack.c.bf16 %v414_v7, %v412_v6 }
 0x137   :  { %666 = vmatmul.bf16.vlgmr.msrb.gmra.mxu3 %v1951_v11 }
 0x138   :  { %v328_v12 = vpop.f32.mrf.mxu1 }
 0x139   :  { %v329_v16 = vadd.f32 %v328_v12, %v1933_v62 }
 0x13b   :  { %1323 = vmatmul.msk.bf16.gmra.mxu2 %vm289_vm0, %v1813_v56  ;;  %v1420_v56 = vld [vmem:[%s2232_s4 + $0xb8] sm:$0xf0]  ;;  %v416_v21 = vmax.f32 %v329_v16, 0.0  ;;  %v1403_v16 = vor.u32 %v1563_v15, %v1402_v14 }
 0x13c   :  { %v1423_v20 = vor.u32 %v1566_v19, %v1420_v56 }
 0x13e   :  { %809 = vmatpush.bf16.msrb.mxu0 %v1423_v20 }
 0x140   :  { %v330_v17 = vpop.f32.mrf.mxu1 }
 0x141   :  { %v331_v18 = vadd.f32 %v330_v17, %v1933_v62  ;;  %v1560_v17 = vld [vmem:[%s2232_s4 + $0x84] sm:$0xf] }
 0x142   :  { %810 = vmatpush.bf16.msrb.mxu0 %v1415_v42 }
 0x143   :  { %v418_v22 = vmax.f32 %v331_v18, 0.0 }
 0x145   :  { %v1970_v23 = vpack.c.bf16 %v418_v22, %v416_v21  ;;  %v1394_v21 = vld [vmem:[%s2232_s4 + $0x80] sm:$0xf]  ;;  %v1561_v22 = vld [vmem:[%s2232_s4 + $0x84] sm:$0xf0] }
 0x146   :  { %811 = vmatpush.bf16.msrb.mxu0 %v1407_v61 }
 0x147   :  { %671 = vmatmul.bf16.gmra.mxu3 %v1970_v23 }
 0x148   :  { %v333_v24 = vpop.f32.mrf.mxu1 }
 0x149   :  { %v334_v30 = vadd.f32 %v333_v24, %v1933_v62  ;;  %v1395_v24 = vor.u32 %v1561_v22, %v1394_v21 }
 0x14b   :  { %1324 = vmatmul.msk.bf16.gmra.mxu2 %vm289_vm0, %v1823_v0  ;;  %v1351_v0 = vor.u32 %v1548_v27, %v1348_v29  ;;  %v420_v32 = vmax.f32 %v334_v30, 0.0 }
 0x14d   :  { %761 = vmatpush.bf16.msra.mxu2 %v1351_v0 }
 0x150   :  { %v335_v33 = vpop.f32.mrf.mxu1 }
 0x151   :  { %v336_v34 = vadd.f32 %v335_v33, %v1933_v62  ;;  %762 = vmatpush.bf16.msra.mxu2 %v1343_v51 }
 0x153   :  { %v422_v41 = vmax.f32 %v336_v34, 0.0 }
 0x155   :  { %v2001_v43 = vpack.c.bf16 %v422_v41, %v420_v32  ;;  %763 = vmatpush.bf16.msra.mxu2 %v1335_v4 }
 0x157   :  { %676 = vmatmul.bf16.gmra.mxu3 %v2001_v43 }
 0x15b   :  { %1325 = vmatmul.msk.bf16.gmra.mxu2 %vm289_vm0, %v1833_v8  ;;  %v1569_v8 = vld [vmem:[%s2232_s4 + $0xc4] sm:$0xf0] }
 0x15c   :  { %v1427_v54 = vor.u32 %v1569_v8, %v1426_v52 }
 0x15e   :  { %v338_v50 = vpop.f32.mrf.mxu2  ;;  %710 = vmatpush.bf16.msrb.mxu1 %v1427_v54 }
 0x15f   :  { %v339_v63 = vadd.f32 %v338_v50, %v1933_v62 }
 0x161   :  { %v424_v6 = vmax.f32 %v339_v63, 0.0 }
 0x162   :  { %711 = vmatpush.bf16.msrb.mxu1 %v1419_v59 }
 0x166   :  { %v340_v3 = vpop.f32.mrf.mxu2  ;;  %712 = vmatpush.bf16.msrb.mxu1 %v1411_v10  ;;  %v1588_v10 = vld [vmem:[%s2234_s6 + $0x60] sm:$0xff] }
 0x167   :  { %v341_v5 = vadd.f32 %v340_v3, %v1933_v62 }
 0x169   :  { %v426_v7 = vmax.f32 %v341_v5, 0.0 }
 0x16a   :  { %713 = vmatpush.bf16.msrb.mxu1 %v1403_v16 }
 0x16b   :  { %1326 = vmatmul.msk.bf16.gmra.mxu2 %vm289_vm0, %v1873_v31  ;;  %v2052_v12 = vpack.c.bf16 %v426_v7, %v424_v6  ;;  %v1396_v31 = vld [vmem:[%s2232_s4 + $0x88] sm:$0xf0]  ;;  %v1580_v6 = vld [vmem:[%s2234_s6 + $0x20] sm:$0xff] }
 0x16c   :  { %v1399_v18 = vor.u32 %v1560_v17, %v1396_v31 }
 0x16d   :  { %681 = vmatmul.bf16.gmra.mxu3 %v2052_v12 }
 0x16e   :  { %v343_v13 = vpop.f32.mrf.mxu2  ;;  %812 = vmatpush.bf16.msrb.mxu0 %v1399_v18  ;;  %714 = vmatpush.bf16.msrb.mxu1 %v1395_v24  ;;  %v1587_v24 = vld [vmem:[%s2234_s6 + $0x58] sm:$0xff] }
 0x16f   :  { %v344_v19 = vadd.f32 %v343_v13, %v1933_v62 }
 0x171   :  { %v428_v25 = vmax.f32 %v344_v19, 0.0 }
 0x172   :  { %1083 = vmatpush.bf16.msra.mxu1 %v1591_v39 }
 0x176   :  { %v345_v56 = vpop.f32.mrf.mxu2  ;;  %1084 = vmatpush.bf16.msra.mxu1 %v1590_v47 }
 0x177   :  { %v346_v20 = vadd.f32 %v345_v56, %v1933_v62 }
 0x179   :  { %v430_v26 = vmax.f32 %v346_v20, 0.0  ;;  %v1579_v20 = vld [vmem:[%s2234_s6 + $0x18] sm:$0xff] }
 0x17a   :  { %1085 = vmatpush.bf16.msra.mxu1 %v1589_v58 }
 0x17b   :  { %1327 = vmatmul.msk.bf16.gmra.mxu2 %vm289_vm0, %v1909_v53  ;;  %v2077_v27 = vpack.c.bf16 %v430_v26, %v428_v25 }
 0x17d   :  { %686 = vmatmul.bf16.gmra.mxu3 %v2077_v27 }
 0x17e   :  { %v348_v28 = vpop.f32.mrf.mxu2  ;;  %1086 = vmatpush.bf16.msra.mxu1 %v1588_v10 }
 0x17f   :  { %v349_v29 = vadd.f32 %v348_v28, %v1933_v62 }
 0x181   :  { %v432_v33 = vmax.f32 %v349_v29, 0.0 }
 0x182   :  { %1087 = vmatpush.bf16.msra.mxu1 %v1587_v24 }
 0x186   :  { %v350_v30 = vpop.f32.mrf.mxu2 }
 0x187   :  { %v351_v0 = vadd.f32 %v350_v30, %v1933_v62 }
 0x189   :  { %v434_v34 = vmax.f32 %v351_v0, 0.0 }
 0x18b   :  { %764 = vmatmul.bf16.vlgmr.msra.gmra.mxu2 %v1951_v11  ;;  %v2086_v36 = vpack.c.bf16 %v434_v34, %v432_v33  ;;  %v1586_v34 = vld [vmem:[%s2234_s6 + $0x50] sm:$0xff] }
 0x18c   :  { %1088 = vmatpush.bf16.msra.mxu1 %v1586_v34 }
 0x18d   :  { %691 = vmatmul.bf16.gmra.mxu3 %v2086_v36 }
 0x18e   :  { %v372_v53 = vpop.f32.mrf.mxu2  ;;  %v353_v48 = vpop.f32.mrf.mxu3 }
 0x18f   :  { %v373_v40 = vadd.f32 %v372_v53, %v2090_v38  ;;  %v354_v37 = vadd.f32 %v353_v48, %v1933_v62 }
 0x191   :  { %v413_v11 = vmax.f32 %v373_v40, 0.0  ;;  %v436_v1 = vmax.f32 %v354_v37, 0.0 }
 0x196   :  { %v374_v32 = vpop.f32.mrf.mxu2  ;;  %v355_v55 = vpop.f32.mrf.mxu3 }
 0x197   :  { %v375_v41 = vadd.f32 %v374_v32, %v2090_v38  ;;  %v356_v59 = vadd.f32 %v355_v55, %v1933_v62 }
 0x199   :  { %v415_v42 = vmax.f32 %v375_v41, 0.0 }
 0x19b   :  { %769 = vmatmul.bf16.gmra.mxu2 %v1970_v23  ;;  %v445_v60 = vpack.c.bf16 %v415_v42, %v413_v11  ;;  %v1581_v23 = vld [vmem:[%s2234_s6 + $0x28] sm:$0xff] }
 0x19c   :  { %1036 = vmatpush.bf16.msra.mxu3 %v1581_v23  ;;  %v1585_v42 = vld [vmem:[%s2234_s6 + $0x48] sm:$0xff] }
 0x19d   :  { %715 = vmatmul.bf16.vlgmr.msrb.gmra.mxu1 %v445_v60  ;;  %813 = vmatmul.bf16.vlgmr.msrb.gmra.mxu0 %v445_v60 }
 0x19e   :  { %v377_v46 = vpop.f32.mrf.mxu2  ;;  %v358_v3 = vpop.f32.mrf.mxu3  ;;  %1089 = vmatpush.bf16.msra.mxu1 %v1585_v42 }
 0x19f   :  { %v378_v49 = vadd.f32 %v377_v46, %v2090_v38  ;;  %v359_v14 = vadd.f32 %v358_v3, %v1933_v62 }
 0x1a0   :  { %1037 = vmatpush.bf16.msra.mxu3 %v1580_v6 }
 0x1a1   :  { %v417_v52 = vmax.f32 %v378_v49, 0.0  ;;  %v440_v17 = vmax.f32 %v359_v14, 0.0  ;;  %v1576_v49 = vld [vmem:[%s2234_s6] sm:$0xff] }
 0x1a4   :  { %1038 = vmatpush.bf16.msra.mxu3 %v1579_v20 }
 0x1a6   :  { %v379_v50 = vpop.f32.mrf.mxu2  ;;  %v360_v13 = vpop.f32.mrf.mxu3 }
 0x1a7   :  { %v380_v51 = vadd.f32 %v379_v50, %v2090_v38  ;;  %v361_v15 = vadd.f32 %v360_v13, %v1933_v62 }
 0x1a9   :  { %v419_v8 = vmax.f32 %v380_v51, 0.0  ;;  %v442_v31 = vmax.f32 %v361_v15, 0.0 }
 0x1ab   :  { %774 = vmatmul.bf16.gmra.mxu2 %v2001_v43  ;;  %v447_v54 = vpack.c.bf16 %v419_v8, %v417_v52  ;;  %v438_v43 = vmax.f32 %v356_v59, 0.0  ;;  %v458_v22 = vpack.c.bf16 %v442_v31, %v440_v17  ;;  %v1584_v8 = vld [vmem:[%s2234_s6 + $0x40] sm:$0xff] }
 0x1ac   :  { %1090 = vmatpush.bf16.msra.mxu1 %v1584_v8 }
 0x1ad   :  { %720 = vmatmul.bf16.gmra.mxu1 %v447_v54  ;;  %818 = vmatmul.bf16.gmra.mxu0 %v447_v54  ;;  %v456_v45 = vpack.c.bf16 %v438_v43, %v436_v1  ;;  %v492_v43 = vld [vmem:[%s2233_s5] sm:$0x3] }
 0x1ae   :  { %v382_v57 = vpop.f32.mrf.mxu2  ;;  %v2167_v6 = vperm.slane %v492_v43, 1 }
 0x1af   :  { %v383_v61 = vadd.f32 %v382_v57, %v2090_v38  ;;  %696 = vmatmul.bf16.gmra.mxu3 %v456_v45 }
 0x1b1   :  { %v421_v4 = vmax.f32 %v383_v61, 0.0 }
 0x1b6   :  { %v384_v63 = vpop.f32.mrf.mxu2 }
 0x1b7   :  { %v385_v2 = vadd.f32 %v384_v63, %v2090_v38 }
 0x1b9   :  { %v423_v5 = vmax.f32 %v385_v2, 0.0 }
 0x1ba   :  { %v667_v50 = vpop.f32.mrf.mxu3 }
 0x1bb   :  { %779 = vmatmul.bf16.gmra.mxu2 %v2052_v12  ;;  %v449_v7 = vpack.c.bf16 %v423_v5, %v421_v4  ;;  %v2165_v5 = vperm.slane %v492_v43, 0 }
 0x1bd   :  { %725 = vmatmul.bf16.gmra.mxu1 %v449_v7  ;;  %823 = vmatmul.bf16.gmra.mxu0 %v449_v7  ;;  %v668_v7 = vadd.f32 %v667_v50, %v2165_v5 }
 0x1be   :  { %v387_v9 = vpop.f32.mrf.mxu2 }
 0x1bf   :  { %v388_v16 = vadd.f32 %v387_v9, %v2090_v38  ;;  %701 = vmatmul.bf16.gmra.mxu3 %v458_v22 }
 0x1c1   :  { %v425_v19 = vmax.f32 %v388_v16, 0.0 }
 0x1c2   :  { %v669_v23 = vpop.f32.mrf.mxu3 }
 0x1c3   :  { %v670_v9 = vadd.f32 %v669_v23, %v2165_v5 }
 0x1c6   :  { %v389_v12 = vpop.f32.mrf.mxu2 }
 0x1c7   :  { %v390_v18 = vadd.f32 %v389_v12, %v2090_v38 }
 0x1c9   :  { %v427_v56 = vmax.f32 %v390_v18, 0.0 }
 0x1ca   :  { %v672_v63 = vpop.f32.mrf.mxu3 }
 0x1cb   :  { %784 = vmatmul.bf16.gmra.mxu2 %v2077_v27  ;;  %v451_v21 = vpack.c.bf16 %v427_v56, %v425_v19  ;;  %v1578_v27 = vld [vmem:[%s2234_s6 + $0x10] sm:$0xff] }
 0x1cc   :  { %1039 = vmatpush.bf16.msra.mxu3 %v1578_v27 }
 0x1cd   :  { %730 = vmatmul.bf16.gmra.mxu1 %v451_v21  ;;  %828 = vmatmul.bf16.gmra.mxu0 %v451_v21 }
 0x1ce   :  { %v392_v62 = vpop.f32.mrf.mxu2 }
 0x1cf   :  { %v393_v25 = vadd.f32 %v392_v62, %v2090_v38 }
 0x1d1   :  { %v429_v29 = vmax.f32 %v393_v25, 0.0 }
 0x1d2   :  { %v674_v2 = vpop.f32.mrf.mxu3 }
 0x1d3   :  { %v675_v27 = vadd.f32 %v674_v2, %v2165_v5 }
 0x1d6   :  { %v394_v26 = vpop.f32.mrf.mxu2 }
 0x1d7   :  { %v395_v28 = vadd.f32 %v394_v26, %v2090_v38 }
 0x1d9   :  { %v431_v30 = vmax.f32 %v395_v28, 0.0 }
 0x1da   :  { %v677_v12 = vpop.f32.mrf.mxu3 }
 0x1db   :  { %789 = vmatmul.bf16.gmra.mxu2 %v2086_v36  ;;  %v453_v0 = vpack.c.bf16 %v431_v30, %v429_v29  ;;  %v1577_v36 = vld [vmem:[%s2234_s6 + $0x8] sm:$0xff]  ;;  %v673_v29 = vadd.f32 %v672_v63, %v2165_v5  ;;  %v678_v50 = vadd.f32 %v677_v12, %v2165_v5 }
 0x1dc   :  { %1040 = vmatpush.bf16.msra.mxu3 %v1577_v36 }
 0x1dd   :  { %735 = vmatmul.bf16.gmra.mxu1 %v453_v0  ;;  %833 = vmatmul.bf16.gmra.mxu0 %v453_v0 }
 0x1de   :  { %v397_v33 = vpop.f32.mrf.mxu2 }
 0x1df   :  { %v398_v35 = vadd.f32 %v397_v33, %v2090_v38 }
 0x1e0   :  { %1041 = vmatpush.bf16.msra.mxu3 %v1576_v49 }
 0x1e1   :  { %v433_v40 = vmax.f32 %v398_v35, 0.0 }
 0x1e2   :  { %v679_v26 = vpop.f32.mrf.mxu3 }
 0x1e3   :  { %v680_v8 = vadd.f32 %v679_v26, %v2165_v5 }
 0x1e6   :  { %v399_v53 = vpop.f32.mrf.mxu2 }
 0x1e7   :  { %v400_v39 = vadd.f32 %v399_v53, %v2090_v38 }
 0x1e9   :  { %v435_v32 = vmax.f32 %v400_v39, 0.0 }
 0x1eb   :  { %794 = vmatmul.bf16.gmra.mxu2 %v456_v45  ;;  %v455_v41 = vpack.c.bf16 %v435_v32, %v433_v40 }
 0x1ed   :  { %740 = vmatmul.bf16.gmra.mxu1 %v455_v41  ;;  %838 = vmatmul.bf16.gmra.mxu0 %v455_v41 }
 0x1ee   :  { %v402_v11 = vpop.f32.mrf.mxu2 }
 0x1ef   :  { %v403_v44 = vadd.f32 %v402_v11, %v2090_v38 }
 0x1f0   :  { %v682_v32 = vpop.f32.mrf.mxu3 }
 0x1f1   :  { %v437_v47 = vmax.f32 %v403_v44, 0.0 }
 0x1f6   :  { %v404_v60 = vpop.f32.mrf.mxu2 }
 0x1f7   :  { %v405_v46 = vadd.f32 %v404_v60, %v2090_v38 }
 0x1f9   :  { %v439_v48 = vmax.f32 %v405_v46, 0.0 }
 0x1fb   :  { %799 = vmatmul.bf16.gmra.mxu2 %v458_v22  ;;  %v457_v51 = vpack.c.bf16 %v439_v48, %v437_v47 }
 0x1fd   :  { %745 = vmatmul.bf16.gmra.mxu1 %v457_v51  ;;  %843 = vmatmul.bf16.gmra.mxu0 %v457_v51  ;;  %v684_v51 = vpop.f32.mrf.mxu3 }
 0x1fe   :  { %v407_v52 = vpop.f32.mrf.mxu2 }
 0x1ff   :  { %v408_v54 = vadd.f32 %v407_v52, %v2090_v38 }
 0x201   :  { %v441_v58 = vmax.f32 %v408_v54, 0.0 }
 0x206   :  { %v409_v55 = vpop.f32.mrf.mxu2 }
 0x207   :  { %v410_v57 = vadd.f32 %v409_v55, %v2090_v38 }
 0x209   :  { %v443_v37 = vmax.f32 %v410_v57, 0.0 }
 0x20b   :  { %v459_v59 = vpack.c.bf16 %v443_v37, %v441_v58 }
 0x20d   :  { %750 = vmatmul.bf16.gmra.mxu1 %v459_v59  ;;  %848 = vmatmul.bf16.gmra.mxu0 %v459_v59 }
 0x20e   :  { %v765_v61 = vpop.f32.mrf.mxu2 }
 0x20f   :  { %v766_v45 = vadd.f32 %v765_v61, %v2167_v6 }
 0x216   :  { %v767_v1 = vpop.f32.mrf.mxu2 }
 0x217   :  { %v768_v10 = vadd.f32 %v767_v1, %v2167_v6 }
 0x21a   :  { %v716_v3 = vpop.f32.mrf.mxu1  ;;  %v814_v4 = vpop.f32.mrf.mxu0 }
 0x21b   :  { %v717_v13 = vadd.f32 %v716_v3, %v668_v7  ;;  %v815_v14 = vadd.f32 %v814_v4, %v766_v45 }
 0x21d   :  { %v854_v18 = vmax.f32 %v717_v13, 0.0  ;;  %v855_v19 = vmax.f32 %v815_v14, 0.0  ;;  %v685_v14 = vadd.f32 %v684_v51, %v2165_v5 }
 0x21e   :  { %v770_v38 = vpop.f32.mrf.mxu2 }
 0x21f   :  { %v771_v30 = vadd.f32 %v770_v38, %v2167_v6  ;;  %v687_v38 = vpop.f32.mrf.mxu3 }
 0x222   :  { %v718_v15 = vpop.f32.mrf.mxu1  ;;  %v816_v16 = vpop.f32.mrf.mxu0 }
 0x223   :  { %v719_v17 = vadd.f32 %v718_v15, %v670_v9  ;;  %v817_v31 = vadd.f32 %v816_v16, %v768_v10  ;;  %v683_v10 = vadd.f32 %v682_v32, %v2165_v5 }
 0x225   :  { %v856_v56 = vmax.f32 %v719_v17, 0.0  ;;  %v857_v20 = vmax.f32 %v817_v31, 0.0 }
 0x226   :  { %v772_v21 = vpop.f32.mrf.mxu2 }
 0x227   :  { %v886_v22 = vpack.c.bf16 %v856_v56, %v854_v18  ;;  %v887_v62 = vpack.c.bf16 %v857_v20, %v855_v19  ;;  %v773_v0 = vadd.f32 %v772_v21, %v2167_v6  ;;  %v689_v18 = vpop.f32.mrf.mxu3 }
 0x229   :  { %1042 = vmatmul.bf16.vlgmr.msra.gmra.mxu3 %v886_v22  ;;  %1091 = vmatmul.bf16.vlgmr.msra.gmra.mxu1 %v887_v62 }
 0x22a   :  { %v721_v24 = vpop.f32.mrf.mxu1  ;;  %v819_v25 = vpop.f32.mrf.mxu0 }
 0x22b   :  { %v722_v33 = vadd.f32 %v721_v24, %v673_v29  ;;  %v820_v34 = vadd.f32 %v819_v25, %v771_v30 }
 0x22d   :  { %v858_v36 = vmax.f32 %v722_v33, 0.0  ;;  %v859_v41 = vmax.f32 %v820_v34, 0.0  ;;  %v690_v34 = vadd.f32 %v689_v18, %v2165_v5 }
 0x22e   :  { %v775_v28 = vpop.f32.mrf.mxu2 }
 0x22f   :  { %v776_v52 = vadd.f32 %v775_v28, %v2167_v6  ;;  %v692_v30 = vpop.f32.mrf.mxu3 }
 0x232   :  { %v723_v35 = vpop.f32.mrf.mxu1  ;;  %v821_v53 = vpop.f32.mrf.mxu0 }
 0x233   :  { %v724_v39 = vadd.f32 %v723_v35, %v675_v27  ;;  %v822_v40 = vadd.f32 %v821_v53, %v773_v0  ;;  %v688_v0 = vadd.f32 %v687_v38, %v2165_v5 }
 0x235   :  { %v860_v11 = vmax.f32 %v724_v39, 0.0  ;;  %v861_v42 = vmax.f32 %v822_v40, 0.0 }
 0x236   :  { %v777_v44 = vpop.f32.mrf.mxu2 }
 0x237   :  { %v889_v60 = vpack.c.bf16 %v861_v42, %v859_v41  ;;  %v888_v46 = vpack.c.bf16 %v860_v11, %v858_v36  ;;  %v778_v23 = vadd.f32 %v777_v44, %v2167_v6 }
 0x239   :  { %1047 = vmatmul.bf16.gmra.mxu3 %v888_v46  ;;  %1096 = vmatmul.bf16.gmra.mxu1 %v889_v60 }
 0x23a   :  { %v726_v47 = vpop.f32.mrf.mxu1  ;;  %v824_v48 = vpop.f32.mrf.mxu0 }
 0x23b   :  { %v727_v54 = vadd.f32 %v726_v47, %v678_v50  ;;  %v825_v55 = vadd.f32 %v824_v48, %v776_v52  ;;  %v694_v47 = vpop.f32.mrf.mxu3  ;;  %v693_v52 = vadd.f32 %v692_v30, %v2165_v5 }
 0x23d   :  { %v862_v61 = vmax.f32 %v727_v54, 0.0  ;;  %v863_v63 = vmax.f32 %v825_v55, 0.0  ;;  %v695_v55 = vadd.f32 %v694_v47, %v2165_v5 }
 0x23e   :  { %v780_v49 = vpop.f32.mrf.mxu2 }
 0x23f   :  { %v781_v13 = vadd.f32 %v780_v49, %v2167_v6 }
 0x242   :  { %v728_v57 = vpop.f32.mrf.mxu1  ;;  %v826_v58 = vpop.f32.mrf.mxu0 }
 0x243   :  { %v729_v37 = vadd.f32 %v728_v57, %v680_v8  ;;  %v827_v59 = vadd.f32 %v826_v58, %v778_v23  ;;  %v697_v23 = vpop.f32.mrf.mxu3 }
 0x245   :  { %v864_v1 = vmax.f32 %v729_v37, 0.0  ;;  %v865_v43 = vmax.f32 %v827_v59, 0.0 }
 0x246   :  { %v782_v2 = vpop.f32.mrf.mxu2 }
 0x247   :  { %v891_v3 = vpack.c.bf16 %v865_v43, %v863_v63  ;;  %v890_v4 = vpack.c.bf16 %v864_v1, %v862_v61  ;;  %v783_v15 = vadd.f32 %v782_v2, %v2167_v6 }
 0x249   :  { %1052 = vmatmul.bf16.gmra.mxu3 %v890_v4  ;;  %1101 = vmatmul.bf16.gmra.mxu1 %v891_v3 }
 0x24a   :  { %v731_v7 = vpop.f32.mrf.mxu1  ;;  %v829_v45 = vpop.f32.mrf.mxu0 }
 0x24b   :  { %v732_v16 = vadd.f32 %v731_v7, %v683_v10  ;;  %v830_v12 = vadd.f32 %v829_v45, %v781_v13  ;;  %v699_v45 = vpop.f32.mrf.mxu3 }
 0x24d   :  { %v866_v20 = vmax.f32 %v732_v16, 0.0  ;;  %v867_v21 = vmax.f32 %v830_v12, 0.0  ;;  %v700_v16 = vadd.f32 %v699_v45, %v2165_v5 }
 0x24e   :  { %v785_v9 = vpop.f32.mrf.mxu2 }
 0x24f   :  { %v786_v33 = vadd.f32 %v785_v9, %v2167_v6 }
 0x252   :  { %v733_v17 = vpop.f32.mrf.mxu1  ;;  %v831_v31 = vpop.f32.mrf.mxu0 }
 0x253   :  { %v734_v19 = vadd.f32 %v733_v17, %v685_v14  ;;  %v832_v56 = vadd.f32 %v831_v31, %v783_v15  ;;  %v698_v14 = vadd.f32 %v697_v23, %v2165_v5 }
 0x255   :  { %v868_v22 = vmax.f32 %v734_v19, 0.0  ;;  %v869_v62 = vmax.f32 %v832_v56, 0.0 }
 0x256   :  { %v787_v24 = vpop.f32.mrf.mxu2 }
 0x257   :  { %v893_v25 = vpack.c.bf16 %v869_v62, %v867_v21  ;;  %v892_v26 = vpack.c.bf16 %v868_v22, %v866_v20  ;;  %v788_v35 = vadd.f32 %v787_v24, %v2167_v6  ;;  %v702_v21 = vpop.f32.mrf.mxu3 }
 0x259   :  { %1057 = vmatmul.bf16.gmra.mxu3 %v892_v26  ;;  %1106 = vmatmul.bf16.gmra.mxu1 %v893_v25 }
 0x25a   :  { %v736_v28 = vpop.f32.mrf.mxu1  ;;  %v834_v29 = vpop.f32.mrf.mxu0 }
 0x25b   :  { %v737_v53 = vadd.f32 %v736_v28, %v688_v0  ;;  %v835_v39 = vadd.f32 %v834_v29, %v786_v33 }
 0x25d   :  { %v870_v11 = vmax.f32 %v737_v53, 0.0  ;;  %v871_v42 = vmax.f32 %v835_v39, 0.0 }
 0x25e   :  { %v790_v27 = vpop.f32.mrf.mxu2 }
 0x25f   :  { %v791_v8 = vadd.f32 %v790_v27, %v2167_v6  ;;  %v704_v0 = vpop.f32.mrf.mxu3 }
 0x260   :  { %v705_v53 = vadd.f32 %v704_v0, %v2165_v5 }
 0x262   :  { %v738_v40 = vpop.f32.mrf.mxu1  ;;  %v836_v32 = vpop.f32.mrf.mxu0 }
 0x263   :  { %v739_v36 = vadd.f32 %v738_v40, %v690_v34  ;;  %v837_v41 = vadd.f32 %v836_v32, %v788_v35  ;;  %v703_v34 = vadd.f32 %v702_v21, %v2165_v5  ;;  %v2204_v5 = vld [vmem:[%s2235_s7] ss:$0 sm:$0xff]  ;;  %s1657_s7 = smov [#allocation2]  }
 0x264   :  { %s1186_s3 = sshll.u32 %s1657_s7, 4  ;;  %s1187_s3 = int_to_ptr.vmem [resolvable:$true] %s1186_s3 }
 0x265   :  { %v872_v44 = vmax.f32 %v739_v36, 0.0  ;;  %v873_v60 = vmax.f32 %v837_v41, 0.0 }
 0x266   :  { %v792_v46 = vpop.f32.mrf.mxu2 }
 0x267   :  { %v894_v48 = vpack.c.bf16 %v872_v44, %v870_v11  ;;  %v895_v49 = vpack.c.bf16 %v873_v60, %v871_v42  ;;  %v793_v57 = vadd.f32 %v792_v46, %v2167_v6 }
 0x269   :  { %1062 = vmatmul.bf16.gmra.mxu3 %v894_v48  ;;  %1111 = vmatmul.bf16.gmra.mxu1 %v895_v49 }
 0x26a   :  { %v741_v50 = vpop.f32.mrf.mxu1  ;;  %v839_v51 = vpop.f32.mrf.mxu0 }
 0x26b   :  { %v742_v58 = vadd.f32 %v741_v50, %v693_v52  ;;  %v840_v37 = vadd.f32 %v839_v51, %v791_v8 }
 0x26d   :  { %v874_v43 = vmax.f32 %v742_v58, 0.0  ;;  %v875_v2 = vmax.f32 %v840_v37, 0.0 }
 0x26e   :  { %v795_v54 = vpop.f32.mrf.mxu2 }
 0x26f   :  { %v796_v15 = vadd.f32 %v795_v54, %v2167_v6 }
 0x272   :  { %v743_v59 = vpop.f32.mrf.mxu1  ;;  %v841_v61 = vpop.f32.mrf.mxu0 }
 0x273   :  { %v744_v63 = vadd.f32 %v743_v59, %v695_v55  ;;  %v842_v1 = vadd.f32 %v841_v61, %v793_v57 }
 0x275   :  { %v876_v3 = vmax.f32 %v744_v63, 0.0  ;;  %v877_v4 = vmax.f32 %v842_v1, 0.0 }
 0x276   :  { %v797_v9 = vpop.f32.mrf.mxu2 }
 0x277   :  { %v896_v38 = vpack.c.bf16 %v876_v3, %v874_v43  ;;  %v897_v7 = vpack.c.bf16 %v877_v4, %v875_v2  ;;  %v798_v12 = vadd.f32 %v797_v9, %v2167_v6 }
 0x279   :  { %1067 = vmatmul.bf16.gmra.mxu3 %v896_v38  ;;  %1116 = vmatmul.bf16.gmra.mxu1 %v897_v7 }
 0x27a   :  { %v746_v10 = vpop.f32.mrf.mxu1  ;;  %v844_v13 = vpop.f32.mrf.mxu0 }
 0x27b   :  { %v747_v17 = vadd.f32 %v746_v10, %v698_v14  ;;  %v845_v31 = vadd.f32 %v844_v13, %v796_v15 }
 0x27d   :  { %v878_v62 = vmax.f32 %v747_v17, 0.0  ;;  %v879_v24 = vmax.f32 %v845_v31, 0.0 }
 0x27e   :  { %v800_v22 = vpop.f32.mrf.mxu2 }
 0x27f   :  { %v801_v35 = vadd.f32 %v800_v22, %v2167_v6 }
 0x282   :  { %v748_v18 = vpop.f32.mrf.mxu1  ;;  %v846_v19 = vpop.f32.mrf.mxu0 }
 0x283   :  { %v749_v56 = vadd.f32 %v748_v18, %v700_v16  ;;  %v847_v20 = vadd.f32 %v846_v19, %v798_v12 }
 0x285   :  { %v880_v25 = vmax.f32 %v749_v56, 0.0  ;;  %v881_v26 = vmax.f32 %v847_v20, 0.0 }
 0x286   :  { %v802_v33 = vpop.f32.mrf.mxu2 }
 0x287   :  { %v898_v28 = vpack.c.bf16 %v880_v25, %v878_v62  ;;  %v899_v29 = vpack.c.bf16 %v881_v26, %v879_v24  ;;  %v803_v39 = vadd.f32 %v802_v33, %v2167_v6 }
 0x289   :  { %1072 = vmatmul.bf16.gmra.mxu3 %v898_v28  ;;  %1121 = vmatmul.bf16.gmra.mxu1 %v899_v29 }
 0x28a   :  { %v751_v30 = vpop.f32.mrf.mxu1  ;;  %v849_v27 = vpop.f32.mrf.mxu0 }
 0x28b   :  { %v752_v40 = vadd.f32 %v751_v30, %v703_v34  ;;  %v850_v32 = vadd.f32 %v849_v27, %v801_v35 }
 0x28d   :  { %v882_v44 = vmax.f32 %v752_v40, 0.0  ;;  %v883_v60 = vmax.f32 %v850_v32, 0.0 }
 0x292   :  { %v753_v36 = vpop.f32.mrf.mxu1  ;;  %v851_v41 = vpop.f32.mrf.mxu0 }
 0x293   :  { %v754_v11 = vadd.f32 %v753_v36, %v705_v53  ;;  %v852_v42 = vadd.f32 %v851_v41, %v803_v39 }
 0x295   :  { %v884_v46 = vmax.f32 %v754_v11, 0.0  ;;  %v885_v47 = vmax.f32 %v852_v42, 0.0 }
 0x297   :  { %v900_v48 = vpack.c.bf16 %v884_v46, %v882_v44  ;;  %v901_v49 = vpack.c.bf16 %v885_v47, %v883_v60 }
 0x299   :  { %1077 = vmatmul.bf16.gmra.mxu3 %v900_v48  ;;  %1126 = vmatmul.bf16.gmra.mxu1 %v901_v49 }
 0x2a6   :  { %v1092_v50 = vpop.f32.mrf.mxu1 }
 0x2ac   :  { %v1043_v6 = vpop.f32.mrf.mxu3 }
 0x2ad   :  { %v1044_v51 = vadd.f32 %v2204_v5, %v1043_v6 }
 0x2ae   :  { %v1094_v52 = vpop.f32.mrf.mxu1 }
 0x2af   :  { %v1093_v8 = vadd.f32 %v1092_v50, %v1044_v51 }
 0x2b1   :  { %1132 = vst [vmem:[#allocation2] sm:$0xff] %v1093_v8 }
 0x2b4   :  { %v1045_v23 = vpop.f32.mrf.mxu3 }
 0x2b5   :  { %v1046_v54 = vadd.f32 %v2204_v5, %v1045_v23 }
 0x2b6   :  { %v1097_v55 = vpop.f32.mrf.mxu1 }
 0x2b7   :  { %v1095_v57 = vadd.f32 %v1094_v52, %v1046_v54 }
 0x2b9   :  { %1133 = vst [vmem:[#allocation2 + $0x8] sm:$0xff] %v1095_v57  ;;  %v1148_v58 = vadd.f32 %v1095_v57, %v1093_v8 }
 0x2bc   :  { %v1048_v37 = vpop.f32.mrf.mxu3 }
 0x2bd   :  { %v1049_v59 = vadd.f32 %v2204_v5, %v1048_v37 }
 0x2be   :  { %v1099_v61 = vpop.f32.mrf.mxu1 }
 0x2bf   :  { %v1098_v63 = vadd.f32 %v1097_v55, %v1049_v59 }
 0x2c1   :  { %1134 = vst [vmem:[#allocation2 + $0x10] sm:$0xff] %v1098_v63  ;;  %v1149_v1 = vadd.f32 %v1148_v58, %v1098_v63 }
 0x2c4   :  { %v1050_v43 = vpop.f32.mrf.mxu3 }
 0x2c5   :  { %v1051_v2 = vadd.f32 %v2204_v5, %v1050_v43 }
 0x2c6   :  { %v1102_v3 = vpop.f32.mrf.mxu1 }
 0x2c7   :  { %v1100_v4 = vadd.f32 %v1099_v61, %v1051_v2 }
 0x2c9   :  { %1135 = vst [vmem:[#allocation2 + $0x18] sm:$0xff] %v1100_v4  ;;  %v1150_v38 = vadd.f32 %v1149_v1, %v1100_v4 }
 0x2cc   :  { %v1053_v7 = vpop.f32.mrf.mxu3 }
 0x2cd   :  { %v1054_v45 = vadd.f32 %v2204_v5, %v1053_v7 }
 0x2ce   :  { %v1104_v9 = vpop.f32.mrf.mxu1 }
 0x2cf   :  { %v1103_v10 = vadd.f32 %v1102_v3, %v1054_v45 }
 0x2d1   :  { %1136 = vst [vmem:[#allocation2 + $0x20] sm:$0xff] %v1103_v10  ;;  %v1151_v13 = vadd.f32 %v1150_v38, %v1103_v10 }
 0x2d4   :  { %v1055_v14 = vpop.f32.mrf.mxu3 }
 0x2d5   :  { %v1056_v15 = vadd.f32 %v2204_v5, %v1055_v14 }
 0x2d6   :  { %v1107_v16 = vpop.f32.mrf.mxu1 }
 0x2d7   :  { %v1105_v12 = vadd.f32 %v1104_v9, %v1056_v15 }
 0x2d9   :  { %1137 = vst [vmem:[#allocation2 + $0x28] sm:$0xff] %v1105_v12  ;;  %v1152_v17 = vadd.f32 %v1151_v13, %v1105_v12 }
 0x2dc   :  { %v1058_v31 = vpop.f32.mrf.mxu3 }
 0x2dd   :  { %v1059_v18 = vadd.f32 %v2204_v5, %v1058_v31 }
 0x2de   :  { %v1109_v19 = vpop.f32.mrf.mxu1 }
 0x2df   :  { %v1108_v56 = vadd.f32 %v1107_v16, %v1059_v18 }
 0x2e1   :  { %1138 = vst [vmem:[#allocation2 + $0x30] sm:$0xff] %v1108_v56  ;;  %v1153_v20 = vadd.f32 %v1152_v17, %v1108_v56 }
 0x2e4   :  { %v1060_v21 = vpop.f32.mrf.mxu3 }
 0x2e5   :  { %v1061_v22 = vadd.f32 %v2204_v5, %v1060_v21 }
 0x2e6   :  { %v1112_v62 = vpop.f32.mrf.mxu1 }
 0x2e7   :  { %v1110_v24 = vadd.f32 %v1109_v19, %v1061_v22 }
 0x2e9   :  { %1139 = vst [vmem:[#allocation2 + $0x38] sm:$0xff] %v1110_v24  ;;  %v1154_v25 = vadd.f32 %v1153_v20, %v1110_v24 }
 0x2eb   :  { %v1155_v8 = vrot.slane %v1154_v25, 4 }
 0x2ec   :  { %v1063_v26 = vpop.f32.mrf.mxu3 }
 0x2ed   :  { %v1064_v28 = vadd.f32 %v2204_v5, %v1063_v26  ;;  %v1156_v57 = vadd.f32 %v1155_v8, %v1154_v25 }
 0x2ee   :  { %v1114_v29 = vpop.f32.mrf.mxu1 }
 0x2ef   :  { %v1113_v30 = vadd.f32 %v1112_v62, %v1064_v28  ;;  %v1157_v1 = vrot.slane %v1156_v57, 2 }
 0x2f1   :  { %1140 = vst [vmem:[#allocation2 + $0x40] sm:$0xff] %v1113_v30  ;;  %v1158_v4 = vadd.f32 %v1157_v1, %v1156_v57 }
 0x2f3   :  { %v1159_v45 = vrot.slane %v1158_v4, 1 }
 0x2f4   :  { %v1065_v27 = vpop.f32.mrf.mxu3 }
 0x2f5   :  { %v1066_v0 = vadd.f32 %v2204_v5, %v1065_v27  ;;  %v1160_v14 = vadd.f32 %v1159_v45, %v1158_v4 }
 0x2f6   :  { %v1117_v33 = vpop.f32.mrf.mxu1 }
 0x2f7   :  { %v1115_v34 = vadd.f32 %v1114_v29, %v1066_v0  ;;  %v1174_v15 = vmul.f32 0.015625, %v1160_v14 }
 0x2f9   :  { %1141 = vst [vmem:[#allocation2 + $0x48] sm:$0xff] %v1115_v34  ;;  %v1161_v51 = vadd.f32 %v1115_v34, %v1113_v30 }
 0x2fc   :  { %v1068_v35 = vpop.f32.mrf.mxu3 }
 0x2fd   :  { %v1069_v53 = vadd.f32 %v2204_v5, %v1068_v35 }
 0x2fe   :  { %v1119_v39 = vpop.f32.mrf.mxu1 }
 0x2ff   :  { %v1118_v40 = vadd.f32 %v1117_v33, %v1069_v53 }
 0x301   :  { %1142 = vst [vmem:[#allocation2 + $0x50] sm:$0xff] %v1118_v40  ;;  %v1162_v23 = vadd.f32 %v1161_v51, %v1118_v40 }
 0x304   :  { %v1070_v32 = vpop.f32.mrf.mxu3 }
 0x305   :  { %v1071_v36 = vadd.f32 %v2204_v5, %v1070_v32 }
 0x306   :  { %v1122_v11 = vpop.f32.mrf.mxu1 }
 0x307   :  { %v1120_v41 = vadd.f32 %v1119_v39, %v1071_v36 }
 0x309   :  { %1143 = vst [vmem:[#allocation2 + $0x58] sm:$0xff] %v1120_v41  ;;  %v1163_v55 = vadd.f32 %v1162_v23, %v1120_v41 }
 0x30c   :  { %v1073_v42 = vpop.f32.mrf.mxu3 }
 0x30d   :  { %v1074_v44 = vadd.f32 %v2204_v5, %v1073_v42 }
 0x30e   :  { %v1124_v46 = vpop.f32.mrf.mxu1 }
 0x30f   :  { %v1123_v60 = vadd.f32 %v1122_v11, %v1074_v44 }
 0x311   :  { %1144 = vst [vmem:[#allocation2 + $0x60] sm:$0xff] %v1123_v60  ;;  %v1164_v58 = vadd.f32 %v1163_v55, %v1123_v60 }
 0x314   :  { %v1075_v47 = vpop.f32.mrf.mxu3 }
 0x315   :  { %v1076_v48 = vadd.f32 %v2204_v5, %v1075_v47 }
 0x316   :  { %v1127_v50 = vpop.f32.mrf.mxu1 }
 0x317   :  { %v1125_v49 = vadd.f32 %v1124_v46, %v1076_v48 }
 0x319   :  { %1145 = vst [vmem:[#allocation2 + $0x68] sm:$0xff] %v1125_v49  ;;  %v1165_v59 = vadd.f32 %v1164_v58, %v1125_v49 }
 0x31c   :  { %v1078_v6 = vpop.f32.mrf.mxu3 }
 0x31d   :  { %v1079_v52 = vadd.f32 %v2204_v5, %v1078_v6 }
 0x31e   :  { %v1129_v63 = vpop.f32.mrf.mxu1 }
 0x31f   :  { %v1128_v54 = vadd.f32 %v1127_v50, %v1079_v52 }
 0x321   :  { %1146 = vst [vmem:[#allocation2 + $0x70] sm:$0xff] %v1128_v54  ;;  %v1166_v43 = vadd.f32 %v1165_v59, %v1128_v54 }
 0x324   :  { %v1080_v37 = vpop.f32.mrf.mxu3 }
 0x325   :  { %v1081_v61 = vadd.f32 %v2204_v5, %v1080_v37 }
 0x327   :  { %v1130_v2 = vadd.f32 %v1129_v63, %v1081_v61 }
 0x329   :  { %1147 = vst [vmem:[#allocation2 + $0x78] sm:$0xff] %v1130_v2  ;;  %v1167_v3 = vadd.f32 %v1166_v43, %v1130_v2 }
 0x32a   :  { %1194 = dma.vmem_to_hbm [thread:$0]  %s1187_s3, 2048, %s1189_s20, [#allocation3], %s1658_s21, %s1658_s21, %s1659_s22  }
 0x32b   :  { %v1168_v38 = vrot.slane %v1167_v3, 4 }
 0x32d   :  { %v1169_v7 = vadd.f32 %v1168_v38, %v1167_v3 }
 0x32f   :  { %v1170_v9 = vrot.slane %v1169_v7, 2 }
 0x331   :  { %v1171_v10 = vadd.f32 %v1170_v9, %v1169_v7 }
 0x333   :  { %v1172_v13 = vrot.slane %v1171_v10, 1 }
 0x335   :  { %v1173_v5 = vadd.f32 %v1172_v13, %v1171_v10 }
 0x337   :  { %v1175_v16 = vmul.f32 0.015625, %v1173_v5 }
 0x339   :  { %v1179_v12 = vsel %vm1178_vm1, %v1175_v16, %v1174_v15 }
 0x33a   :  { %1181 = vst [vmem:[#allocation4] sm:$0x3] %v1179_v12 }
 0x33b   :  { %1205 = dma.vmem_to_hbm [thread:$0]  %s1201_s23, 32, %s1203_s26, [#allocation5]  }
 0x33c   :  { %1653 = dma.done.wait [#allocation3], 2048  }
 0x33d   :  { %1654 = vsyncadd [#allocation3], 4294965248 }
 0x33e   :  { %1655 = dma.done.wait [#allocation5], 32  }
 0x33f   :  { %1656 = vsyncadd [#allocation5], 4294967264 }
 0x340   :  { %1214 = vsyncpa [#allocation3], 1 }
 0x341   :  { %1215 = vsyncpa [#allocation5], 1 }

</bundles_post_ra>
